<compile_context>
chip_gen: v7x
topology: tpu7x:2x2x1
jax: 0.10.0
libtpu: 0.0.40
codegen_flags: <defaults>
</compile_context>

<pallas_src>
import jax
import jax.numpy as jnp
from jax.experimental import pallas as pl
from jax.experimental.pallas import tpu as pltpu

LANE = 128     # lane width (last dim alignment)
SUBLANE = 8    # f32 sublane (second-to-last dim alignment)


def _round_up(n, m):
    return ((n + m - 1) // m) * m


# ---------------------------------------------------------------------------
# Kernel
# ---------------------------------------------------------------------------
def autoencoder_kernel(
    x_ref,                                                      # (TILE_B, in_p) bf16
    we1_ref, be1_ref, we2_ref, be2_ref, we3_ref, be3_ref,       # encoder params
    w1_ref, b1_ref, w2_ref, b2_ref, w3_ref, b3_ref,             # decoder fc1..fc3
    out_ref,                                                    # (TILE_B, in_p) f32
):
    def linear(h, w_ref, b_ref):
        # bf16 operands on the MXU, f32 accumulation; bias add stays f32 (VPU).
        return (
            jnp.dot(h.astype(jnp.bfloat16), w_ref[...],
                    preferred_element_type=jnp.float32)
            + b_ref[...]
        )

    h = x_ref[...]
    # encoder: Linear -> ReLU (x3)
    h = jnp.maximum(linear(h, we1_ref, be1_ref), 0.0)
    h = jnp.maximum(linear(h, we2_ref, be2_ref), 0.0)
    h = jnp.maximum(linear(h, we3_ref, be3_ref), 0.0)
    # decoder: relu(fc1) -> relu(fc2) -> sigmoid(fc3)
    h = jnp.maximum(linear(h, w1_ref, b1_ref), 0.0)
    h = jnp.maximum(linear(h, w2_ref, b2_ref), 0.0)
    o = linear(h, w3_ref, b3_ref)
    out_ref[...] = jax.nn.sigmoid(o).astype(out_ref.dtype)      # sigmoid on the EUP


# ---------------------------------------------------------------------------
# Wrapper
# ---------------------------------------------------------------------------
def _pad2(a, rows, cols):
    return jnp.pad(a, ((0, rows - a.shape[0]), (0, cols - a.shape[1])))


def autoencoder_forward(x, params, *, tile_b=256):
    """x: (batch, input_size) f32. params: dict of (in, out) weights / (1, out) biases."""
    batch, input_size = x.shape
    hidden_size = params["w1"].shape[0]
    d2 = input_size // 2
    d4 = input_size // 4

    # lane-dense padded layer widths
    in_p = _round_up(input_size, LANE)
    d2_p = _round_up(d2, LANE)
    d4_p = _round_up(d4, LANE)
    hd_p = _round_up(hidden_size, LANE)

    def wp(name, k_p, n_p):   # weight: zero-pad, bf16 for the MXU
        return _pad2(params[name], k_p, n_p).astype(jnp.bfloat16)

    def bp(name, n_p):        # bias: zero-pad, keep f32 for the VPU epilogue
        return _pad2(params[name], 1, n_p).astype(jnp.float32)

    weights = (
        wp("we1", in_p, d2_p), bp("be1", d2_p),
        wp("we2", d2_p, d4_p), bp("be2", d4_p),
        wp("we3", d4_p, hd_p), bp("be3", hd_p),
        wp("w1", hd_p, d4_p),  bp("b1", d4_p),
        wp("w2", d4_p, d2_p),  bp("b2", d2_p),
        wp("w3", d2_p, in_p),  bp("b3", in_p),
    )

    # batch tiling: big sublane-aligned tile, batch zero-padded to a tile multiple
    tile_b = max(SUBLANE, min(tile_b, _round_up(batch, SUBLANE)))
    batch_p = _round_up(batch, tile_b)
    x_p = jnp.pad(
        x, ((0, batch_p - batch), (0, in_p - input_size))
    ).astype(jnp.bfloat16)

    grid = (batch_p // tile_b,)

    x_spec = pl.BlockSpec((tile_b, in_p), lambda i: (i, 0))
    # constant index_map -> weights/biases stay resident in VMEM across the grid
    weight_specs = [pl.BlockSpec(w.shape, lambda i: (0, 0)) for w in weights]
    out_spec = pl.BlockSpec((tile_b, in_p), lambda i: (i, 0))

    # VMEM budget: resident weights + double-buffered bf16 x tile and f32 out tile
    weight_bytes = sum(int(w.size) * w.dtype.itemsize for w in weights)
    act_bytes = 2 * tile_b * in_p * 2 + 2 * tile_b * in_p * 4
    vmem_limit = int(min(max(4 * (weight_bytes + act_bytes), 16 * 1024 * 1024),
                         48 * 1024 * 1024))

    out_p = pl.pallas_call(
        autoencoder_kernel,
        out_shape=jax.ShapeDtypeStruct((batch_p, in_p), jnp.float32),
        grid=grid,
        in_specs=[x_spec] + weight_specs,
        out_specs=out_spec,
        compiler_params=pltpu.CompilerParams(
            dimension_semantics=("parallel",),
            vmem_limit_bytes=vmem_limit,
        ),
    )(x_p, *weights)

    # drop padded batch rows and padded (sigmoid(0)=0.5) output columns
    return out_p[:batch, :input_size]


# ---------------------------------------------------------------------------
# Parameter init (PyTorch nn.Linear default) + pure-JAX reference
# ---------------------------------------------------------------------------
def _init_linear(key, fan_in, fan_out):
    kw, kb = jax.random.split(key)
    bound = 1.0 / jnp.sqrt(jnp.float32(fan_in))
    # stored (in, out) so every layer is x @ W + b (== PyTorch x @ W.T)
    w = jax.random.uniform(kw, (fan_in, fan_out), jnp.float32, -bound, bound)
    b = jax.random.uniform(kb, (1, fan_out), jnp.float32, -bound, bound)
    return w, b


def make_params(key, input_size, hidden_size):
    keys = jax.random.split(key, 6)
    p = {}
    # encoder: in -> in//2 -> in//4 -> hidden
    p["we1"], p["be1"] = _init_linear(keys[0], input_size, input_size // 2)
    p["we2"], p["be2"] = _init_linear(keys[1], input_size // 2, input_size // 4)
    p["we3"], p["be3"] = _init_linear(keys[2], input_size // 4, hidden_size)
    # decoder: fc1 hidden -> in//4, fc2 in//4 -> in//2, fc3 in//2 -> in
    p["w1"], p["b1"] = _init_linear(keys[3], hidden_size, input_size // 4)
    p["w2"], p["b2"] = _init_linear(keys[4], input_size // 4, input_size // 2)
    p["w3"], p["b3"] = _init_linear(keys[5], input_size // 2, input_size)
    return p


def reference_forward(x, p):
    h = jnp.maximum(x @ p["we1"] + p["be1"], 0.0)
    h = jnp.maximum(h @ p["we2"] + p["be2"], 0.0)
    h = jnp.maximum(h @ p["we3"] + p["be3"], 0.0)
    h = jnp.maximum(h @ p["w1"] + p["b1"], 0.0)
    h = jnp.maximum(h @ p["w2"] + p["b2"], 0.0)
    return jax.nn.sigmoid(h @ p["w3"] + p["b3"])


if __name__ == "__main__":
    batch = 8
    input_size = 128
    hidden_size = 32

    key = jax.random.PRNGKey(0)
    kx, kp = jax.random.split(key)
    x = jax.random.uniform(kx, (batch, input_size), jnp.float32)
    params = make_params(kp, input_size, hidden_size)

    out = autoencoder_forward(x, params)
    out = jax.block_until_ready(out)

    assert out.shape == (batch, input_size), out.shape
    assert out.dtype == jnp.float32
    assert bool(jnp.all(jnp.isfinite(out)))
    assert bool(jnp.all((out >= 0.0) & (out <= 1.0)))  # sigmoid output range

    ref = reference_forward(x, params)
    max_err = float(jnp.max(jnp.abs(out - ref)))
    assert max_err < 5e-2, max_err  # bf16 matmul tolerance

    print("KERNEL_OK")
</pallas_src>

<mosaic_0001>
module attributes {stable_mosaic.version = 11 : i64} {
  func.func @autoencoder_kernel(%arg0: i32, %arg1: memref<8x128xbf16, #tpu.memory_space<vmem>>, %arg2: memref<128x128xbf16, #tpu.memory_space<vmem>>, %arg3: memref<1x128xf32, #tpu.memory_space<vmem>>, %arg4: memref<128x128xbf16, #tpu.memory_space<vmem>>, %arg5: memref<1x128xf32, #tpu.memory_space<vmem>>, %arg6: memref<128x128xbf16, #tpu.memory_space<vmem>>, %arg7: memref<1x128xf32, #tpu.memory_space<vmem>>, %arg8: memref<128x128xbf16, #tpu.memory_space<vmem>>, %arg9: memref<1x128xf32, #tpu.memory_space<vmem>>, %arg10: memref<128x128xbf16, #tpu.memory_space<vmem>>, %arg11: memref<1x128xf32, #tpu.memory_space<vmem>>, %arg12: memref<128x128xbf16, #tpu.memory_space<vmem>>, %arg13: memref<1x128xf32, #tpu.memory_space<vmem>>, %arg14: memref<8x128xf32, #tpu.memory_space<vmem>>) attributes {dimension_semantics = [#tpu.dimension_semantics<parallel>], iteration_bounds = array<i64: 1>, scalar_prefetch = 0 : i64, scratch_operands = 0 : i64, tpu.core_type = #tpu.core_type<tc>, window_params = [{transform_indices = @transform_0, window_bounds = array<i64: 8, 128>}, {pipeline_mode = #tpu.pipeline_mode<synchronous>, transform_indices = @transform_1, window_bounds = array<i64: 128, 128>}, {pipeline_mode = #tpu.pipeline_mode<synchronous>, transform_indices = @transform_2, window_bounds = array<i64: 1, 128>}, {pipeline_mode = #tpu.pipeline_mode<synchronous>, transform_indices = @transform_3, window_bounds = array<i64: 128, 128>}, {pipeline_mode = #tpu.pipeline_mode<synchronous>, transform_indices = @transform_4, window_bounds = array<i64: 1, 128>}, {pipeline_mode = #tpu.pipeline_mode<synchronous>, transform_indices = @transform_5, window_bounds = array<i64: 128, 128>}, {pipeline_mode = #tpu.pipeline_mode<synchronous>, transform_indices = @transform_6, window_bounds = array<i64: 1, 128>}, {pipeline_mode = #tpu.pipeline_mode<synchronous>, transform_indices = @transform_7, window_bounds = array<i64: 128, 128>}, {pipeline_mode = #tpu.pipeline_mode<synchronous>, transform_indices = @transform_8, window_bounds = array<i64: 1, 128>}, {pipeline_mode = #tpu.pipeline_mode<synchronous>, transform_indices = @transform_9, window_bounds = array<i64: 128, 128>}, {pipeline_mode = #tpu.pipeline_mode<synchronous>, transform_indices = @transform_10, window_bounds = array<i64: 1, 128>}, {pipeline_mode = #tpu.pipeline_mode<synchronous>, transform_indices = @transform_11, window_bounds = array<i64: 128, 128>}, {pipeline_mode = #tpu.pipeline_mode<synchronous>, transform_indices = @transform_12, window_bounds = array<i64: 1, 128>}, {transform_indices = @transform_13, window_bounds = array<i64: 8, 128>}]} {
    %c0 = arith.constant 0 : index
    %c0_0 = arith.constant 0 : index
    %0 = vector.load %arg1[%c0, %c0_0] : memref<8x128xbf16, #tpu.memory_space<vmem>>, vector<8x128xbf16>
    %c0_1 = arith.constant 0 : index
    %c0_2 = arith.constant 0 : index
    %1 = vector.load %arg2[%c0_1, %c0_2] : memref<128x128xbf16, #tpu.memory_space<vmem>>, vector<128x128xbf16>
    %cst = arith.constant dense<0.000000e+00> : vector<8x128xf32>
    %2 = tpu.matmul %0, %1, %cst {dimension_numbers = #tpu.dot_dimension_numbers<[1], [0], [0], [1], [0, 0, 1, 1], [], []>} : vector<8x128xbf16>, vector<128x128xbf16>, vector<8x128xf32> -> vector<8x128xf32>
    %c0_3 = arith.constant 0 : index
    %c0_4 = arith.constant 0 : index
    %3 = vector.load %arg3[%c0_3, %c0_4] : memref<1x128xf32, #tpu.memory_space<vmem>>, vector<1x128xf32>
    %4 = vector.broadcast %3 : vector<1x128xf32> to vector<8x128xf32>
    %5 = arith.addf %2, %4 : vector<8x128xf32>
    %cst_5 = arith.constant 0.000000e+00 : f32
    %6 = vector.broadcast %cst_5 : f32 to vector<8x128xf32>
    %7 = arith.maximumf %5, %6 : vector<8x128xf32>
    %8 = arith.truncf %7 : vector<8x128xf32> to vector<8x128xbf16>
    %c0_6 = arith.constant 0 : index
    %c0_7 = arith.constant 0 : index
    %9 = vector.load %arg4[%c0_6, %c0_7] : memref<128x128xbf16, #tpu.memory_space<vmem>>, vector<128x128xbf16>
    %cst_8 = arith.constant dense<0.000000e+00> : vector<8x128xf32>
    %10 = tpu.matmul %8, %9, %cst_8 {dimension_numbers = #tpu.dot_dimension_numbers<[1], [0], [0], [1], [0, 0, 1, 1], [], []>} : vector<8x128xbf16>, vector<128x128xbf16>, vector<8x128xf32> -> vector<8x128xf32>
    %c0_9 = arith.constant 0 : index
    %c0_10 = arith.constant 0 : index
    %11 = vector.load %arg5[%c0_9, %c0_10] : memref<1x128xf32, #tpu.memory_space<vmem>>, vector<1x128xf32>
    %12 = vector.broadcast %11 : vector<1x128xf32> to vector<8x128xf32>
    %13 = arith.addf %10, %12 : vector<8x128xf32>
    %cst_11 = arith.constant 0.000000e+00 : f32
    %14 = vector.broadcast %cst_11 : f32 to vector<8x128xf32>
    %15 = arith.maximumf %13, %14 : vector<8x128xf32>
    %16 = arith.truncf %15 : vector<8x128xf32> to vector<8x128xbf16>
    %c0_12 = arith.constant 0 : index
    %c0_13 = arith.constant 0 : index
    %17 = vector.load %arg6[%c0_12, %c0_13] : memref<128x128xbf16, #tpu.memory_space<vmem>>, vector<128x128xbf16>
    %cst_14 = arith.constant dense<0.000000e+00> : vector<8x128xf32>
    %18 = tpu.matmul %16, %17, %cst_14 {dimension_numbers = #tpu.dot_dimension_numbers<[1], [0], [0], [1], [0, 0, 1, 1], [], []>} : vector<8x128xbf16>, vector<128x128xbf16>, vector<8x128xf32> -> vector<8x128xf32>
    %c0_15 = arith.constant 0 : index
    %c0_16 = arith.constant 0 : index
    %19 = vector.load %arg7[%c0_15, %c0_16] : memref<1x128xf32, #tpu.memory_space<vmem>>, vector<1x128xf32>
    %20 = vector.broadcast %19 : vector<1x128xf32> to vector<8x128xf32>
    %21 = arith.addf %18, %20 : vector<8x128xf32>
    %cst_17 = arith.constant 0.000000e+00 : f32
    %22 = vector.broadcast %cst_17 : f32 to vector<8x128xf32>
    %23 = arith.maximumf %21, %22 : vector<8x128xf32>
    %24 = arith.truncf %23 : vector<8x128xf32> to vector<8x128xbf16>
    %c0_18 = arith.constant 0 : index
    %c0_19 = arith.constant 0 : index
    %25 = vector.load %arg8[%c0_18, %c0_19] : memref<128x128xbf16, #tpu.memory_space<vmem>>, vector<128x128xbf16>
    %cst_20 = arith.constant dense<0.000000e+00> : vector<8x128xf32>
    %26 = tpu.matmul %24, %25, %cst_20 {dimension_numbers = #tpu.dot_dimension_numbers<[1], [0], [0], [1], [0, 0, 1, 1], [], []>} : vector<8x128xbf16>, vector<128x128xbf16>, vector<8x128xf32> -> vector<8x128xf32>
    %c0_21 = arith.constant 0 : index
    %c0_22 = arith.constant 0 : index
    %27 = vector.load %arg9[%c0_21, %c0_22] : memref<1x128xf32, #tpu.memory_space<vmem>>, vector<1x128xf32>
    %28 = vector.broadcast %27 : vector<1x128xf32> to vector<8x128xf32>
    %29 = arith.addf %26, %28 : vector<8x128xf32>
    %cst_23 = arith.constant 0.000000e+00 : f32
    %30 = vector.broadcast %cst_23 : f32 to vector<8x128xf32>
    %31 = arith.maximumf %29, %30 : vector<8x128xf32>
    %32 = arith.truncf %31 : vector<8x128xf32> to vector<8x128xbf16>
    %c0_24 = arith.constant 0 : index
    %c0_25 = arith.constant 0 : index
    %33 = vector.load %arg10[%c0_24, %c0_25] : memref<128x128xbf16, #tpu.memory_space<vmem>>, vector<128x128xbf16>
    %cst_26 = arith.constant dense<0.000000e+00> : vector<8x128xf32>
    %34 = tpu.matmul %32, %33, %cst_26 {dimension_numbers = #tpu.dot_dimension_numbers<[1], [0], [0], [1], [0, 0, 1, 1], [], []>} : vector<8x128xbf16>, vector<128x128xbf16>, vector<8x128xf32> -> vector<8x128xf32>
    %c0_27 = arith.constant 0 : index
    %c0_28 = arith.constant 0 : index
    %35 = vector.load %arg11[%c0_27, %c0_28] : memref<1x128xf32, #tpu.memory_space<vmem>>, vector<1x128xf32>
    %36 = vector.broadcast %35 : vector<1x128xf32> to vector<8x128xf32>
    %37 = arith.addf %34, %36 : vector<8x128xf32>
    %cst_29 = arith.constant 0.000000e+00 : f32
    %38 = vector.broadcast %cst_29 : f32 to vector<8x128xf32>
    %39 = arith.maximumf %37, %38 : vector<8x128xf32>
    %40 = arith.truncf %39 : vector<8x128xf32> to vector<8x128xbf16>
    %c0_30 = arith.constant 0 : index
    %c0_31 = arith.constant 0 : index
    %41 = vector.load %arg12[%c0_30, %c0_31] : memref<128x128xbf16, #tpu.memory_space<vmem>>, vector<128x128xbf16>
    %cst_32 = arith.constant dense<0.000000e+00> : vector<8x128xf32>
    %42 = tpu.matmul %40, %41, %cst_32 {dimension_numbers = #tpu.dot_dimension_numbers<[1], [0], [0], [1], [0, 0, 1, 1], [], []>} : vector<8x128xbf16>, vector<128x128xbf16>, vector<8x128xf32> -> vector<8x128xf32>
    %c0_33 = arith.constant 0 : index
    %c0_34 = arith.constant 0 : index
    %43 = vector.load %arg13[%c0_33, %c0_34] : memref<1x128xf32, #tpu.memory_space<vmem>>, vector<1x128xf32>
    %44 = vector.broadcast %43 : vector<1x128xf32> to vector<8x128xf32>
    %45 = arith.addf %42, %44 : vector<8x128xf32>
    %46 = arith.negf %45 : vector<8x128xf32>
    %47 = math.exp %46 : vector<8x128xf32>
    %cst_35 = arith.constant 1.000000e+00 : f32
    %48 = vector.broadcast %cst_35 : f32 to vector<8x128xf32>
    %49 = arith.addf %48, %47 : vector<8x128xf32>
    %50 = arith.divf %48, %49 : vector<8x128xf32>
    %c0_36 = arith.constant 0 : index
    %c0_37 = arith.constant 0 : index
    %51 = vector.load %arg14[%c0_36, %c0_37] : memref<8x128xf32, #tpu.memory_space<vmem>>, vector<8x128xf32>
    tpu.vector_store %arg14[%c0_36, %c0_37], %50 {strides = array<i32>} : memref<8x128xf32, #tpu.memory_space<vmem>>, vector<8x128xf32>,
    return
  }
  func.func @transform_0(%arg0: i32) -> (i32, i32) {
    %c0_i32 = arith.constant 0 : i32
    %c0_i32_0 = arith.constant 0 : i32
    return %arg0, %c0_i32 : i32, i32
  }
  func.func @transform_1(%arg0: i32) -> (i32, i32) {
    %c0_i32 = arith.constant 0 : i32
    %c0_i32_0 = arith.constant 0 : i32
    %c0_i32_1 = arith.constant 0 : i32
    return %c0_i32, %c0_i32_0 : i32, i32
  }
  func.func @transform_2(%arg0: i32) -> (i32, i32) {
    %c0_i32 = arith.constant 0 : i32
    %c0_i32_0 = arith.constant 0 : i32
    %c0_i32_1 = arith.constant 0 : i32
    return %c0_i32, %c0_i32_0 : i32, i32
  }
  func.func @transform_3(%arg0: i32) -> (i32, i32) {
    %c0_i32 = arith.constant 0 : i32
    %c0_i32_0 = arith.constant 0 : i32
    %c0_i32_1 = arith.constant 0 : i32
    return %c0_i32, %c0_i32_0 : i32, i32
  }
  func.func @transform_4(%arg0: i32) -> (i32, i32) {
    %c0_i32 = arith.constant 0 : i32
    %c0_i32_0 = arith.constant 0 : i32
    %c0_i32_1 = arith.constant 0 : i32
    return %c0_i32, %c0_i32_0 : i32, i32
  }
  func.func @transform_5(%arg0: i32) -> (i32, i32) {
    %c0_i32 = arith.constant 0 : i32
    %c0_i32_0 = arith.constant 0 : i32
    %c0_i32_1 = arith.constant 0 : i32
    return %c0_i32, %c0_i32_0 : i32, i32
  }
  func.func @transform_6(%arg0: i32) -> (i32, i32) {
    %c0_i32 = arith.constant 0 : i32
    %c0_i32_0 = arith.constant 0 : i32
    %c0_i32_1 = arith.constant 0 : i32
    return %c0_i32, %c0_i32_0 : i32, i32
  }
  func.func @transform_7(%arg0: i32) -> (i32, i32) {
    %c0_i32 = arith.constant 0 : i32
    %c0_i32_0 = arith.constant 0 : i32
    %c0_i32_1 = arith.constant 0 : i32
    return %c0_i32, %c0_i32_0 : i32, i32
  }
  func.func @transform_8(%arg0: i32) -> (i32, i32) {
    %c0_i32 = arith.constant 0 : i32
    %c0_i32_0 = arith.constant 0 : i32
    %c0_i32_1 = arith.constant 0 : i32
    return %c0_i32, %c0_i32_0 : i32, i32
  }
  func.func @transform_9(%arg0: i32) -> (i32, i32) {
    %c0_i32 = arith.constant 0 : i32
    %c0_i32_0 = arith.constant 0 : i32
    %c0_i32_1 = arith.constant 0 : i32
    return %c0_i32, %c0_i32_0 : i32, i32
  }
  func.func @transform_10(%arg0: i32) -> (i32, i32) {
    %c0_i32 = arith.constant 0 : i32
    %c0_i32_0 = arith.constant 0 : i32
    %c0_i32_1 = arith.constant 0 : i32
    return %c0_i32, %c0_i32_0 : i32, i32
  }
  func.func @transform_11(%arg0: i32) -> (i32, i32) {
    %c0_i32 = arith.constant 0 : i32
    %c0_i32_0 = arith.constant 0 : i32
    %c0_i32_1 = arith.constant 0 : i32
    return %c0_i32, %c0_i32_0 : i32, i32
  }
  func.func @transform_12(%arg0: i32) -> (i32, i32) {
    %c0_i32 = arith.constant 0 : i32
    %c0_i32_0 = arith.constant 0 : i32
    %c0_i32_1 = arith.constant 0 : i32
    return %c0_i32, %c0_i32_0 : i32, i32
  }
  func.func @transform_13(%arg0: i32) -> (i32, i32) {
    %c0_i32 = arith.constant 0 : i32
    %c0_i32_0 = arith.constant 0 : i32
    return %arg0, %c0_i32 : i32, i32
  }
}

</mosaic_0001>

<bundles_post_ra>
// kernel: tpu_custom_call.1
= control target key start
LH: loop header
LB: loop body
LE: loop exit
PB: predicated region body
PF: predicated region fallthrough
CT: control target
= control target key end

     0   :  { %18 = vsyncpa [#allocation3], 0  ;;  %s1594_s0 = inlined_call_operand.hbm [shape: bf16[8,128], index: 0, kind: input, shape index: {}]   ;;  %s1595_s1 = inlined_call_operand.hbm [shape: bf16[128,128], index: 1, kind: input, shape index: {}]   ;;  %s1596_s2 = inlined_call_operand.vmem [shape: f32[1,128], index: 2, kind: input, shape index: {}]   ;;  %s1597_s3 = inlined_call_operand.hbm [shape: bf16[128,128], index: 3, kind: input, shape index: {}]   ;;  %s1598_s4 = inlined_call_operand.vmem [shape: f32[1,128], index: 4, kind: input, shape index: {}]   ;;  %s1599_s5 = inlined_call_operand.hbm [shape: bf16[128,128], index: 5, kind: input, shape index: {}]   ;;  %s1600_s6 = inlined_call_operand.vmem [shape: f32[1,128], index: 6, kind: input, shape index: {}]   ;;  %s1601_s7 = inlined_call_operand.hbm [shape: bf16[128,128], index: 7, kind: input, shape index: {}]   ;;  %s1602_s8 = inlined_call_operand.vmem [shape: f32[1,128], index: 8, kind: input, shape index: {}]   ;;  %s1603_s9 = inlined_call_operand.hbm [shape: bf16[128,128], index: 9, kind: input, shape index: {}]   ;;  %s1604_s10 = inlined_call_operand.vmem [shape: f32[1,128], index: 10, kind: input, shape index: {}]   ;;  %s1605_s11 = inlined_call_operand.hbm [shape: bf16[128,128], index: 11, kind: input, shape index: {}]   ;;  %s1606_s12 = inlined_call_operand.vmem [shape: f32[1,128], index: 12, kind: input, shape index: {}]   ;;  %s1607_s13 = inlined_call_operand.hbm [shape: f32[8,128], index: 13, kind: output, shape index: {}]  }
   0x1   :  { %19 = vsyncpa [#allocation6], 0 }
   0x2   :  { %20 = vsyncpa [#allocation9], 0 }
   0x3   :  { %21 = vsyncpa [#allocation12], 0 }
   0x4   :  { %22 = vsyncpa [#allocation4], 0  ;;  %s1320_s25 = smov [#allocation5]   ;;  %s1134_s29 = scalar_lea.hbm %s1595_s1, 1024 }
   0x5   :  { %s38_s26 = sshll.u32 %s1320_s25, 4  ;;  %p1135_p0 = scmp.ne.s32.totalorder %s1595_s1, %s1134_s29  ;;  %s39_s26 = int_to_ptr.vmem [resolvable:$true] %s38_s26 }
   0x6   :  { %p1138_p1 = scmp.lt.u32.totalorder %s1134_s29, %s1595_s1 }
   0x8   :  { %p1140_p2 = pnand %p1138_p1, %p1135_p0 }
   0xa   :  { %1143 = shalt.err (!%p1140_p2)
}
   0xb   :  { %s1144_s17 = scalar_lea.vmem %s39_s26, 1024  ;;  %p1149_p4 = scmp.lt.s32.totalorder %s39_s26, %s39_s26 }
   0xc   :  { %p1145_p3 = scmp.ne.s32.totalorder %s39_s26, %s1144_s17  ;;  %p1150_p5 = scmp.lt.s32.totalorder %s1144_s17, %s1144_s17 }
   0xe   :  { %p1151_p6 = por %p1150_p5, %p1149_p4 }
  0x10   :  { %p1152_p7 = pnand %p1151_p6, %p1145_p3 }
  0x12   :  { %1155 = shalt.err (!%p1152_p7)
}
  0x13   :  { %s1321_s18 = smov 64   ;;  %s1322_s19 = smov 4  }
  0x14   :  { %44 = dma.hbm_to_vmem [thread:$0]  %s1595_s1, 1024, %s39_s26, [#allocation6], %s1321_s18, %s1321_s18, %s1322_s19  }
  0x15   :  { %s1323_s22 = smov [#allocation8]   ;;  %s1324_s24 = smov [#allocation11]  }
  0x16   :  { %s66_s23 = sshll.u32 %s1323_s22, 4  ;;  %s94_s25 = sshll.u32 %s1324_s24, 4  ;;  %s67_s23 = int_to_ptr.vmem [resolvable:$true] %s66_s23  ;;  %s95_s25 = int_to_ptr.vmem [resolvable:$true] %s94_s25 }
  0x17   :  { %s1156_s29 = scalar_lea.hbm %s1599_s5, 1024 }
  0x18   :  { %p1157_p8 = scmp.ne.s32.totalorder %s1599_s5, %s1156_s29  ;;  %p1160_p9 = scmp.lt.u32.totalorder %s1156_s29, %s1599_s5 }
  0x1a   :  { %p1162_p10 = pnand %p1160_p9, %p1157_p8 }
  0x1c   :  { %1165 = shalt.err (!%p1162_p10)
}
  0x1d   :  { %s1166_s1 = scalar_lea.vmem %s67_s23, 1024  ;;  %p1171_p12 = scmp.lt.s32.totalorder %s67_s23, %s67_s23 }
  0x1e   :  { %p1167_p11 = scmp.ne.s32.totalorder %s67_s23, %s1166_s1  ;;  %p1172_p13 = scmp.lt.s32.totalorder %s1166_s1, %s1166_s1 }
  0x20   :  { %p1173_p0 = por %p1172_p13, %p1171_p12 }
  0x22   :  { %p1174_p1 = pnand %p1173_p0, %p1167_p11 }
  0x24   :  { %1177 = shalt.err (!%p1174_p1)
}
  0x25   :  { %72 = dma.hbm_to_vmem [thread:$0]  %s1599_s5, 1024, %s67_s23, [#allocation9], %s1321_s18, %s1321_s18, %s1322_s19  }
  0x26   :  { %s1178_s22 = scalar_lea.hbm %s1603_s9, 1024 }
  0x27   :  { %p1179_p2 = scmp.ne.s32.totalorder %s1603_s9, %s1178_s22  ;;  %p1182_p3 = scmp.lt.u32.totalorder %s1178_s22, %s1603_s9 }
  0x29   :  { %p1184_p4 = pnand %p1182_p3, %p1179_p2 }
  0x2b   :  { %1187 = shalt.err (!%p1184_p4)
}
  0x2c   :  { %s1188_s30 = scalar_lea.vmem %s95_s25, 1024  ;;  %p1193_p6 = scmp.lt.s32.totalorder %s95_s25, %s95_s25 }
  0x2d   :  { %p1189_p5 = scmp.ne.s32.totalorder %s95_s25, %s1188_s30  ;;  %p1194_p7 = scmp.lt.s32.totalorder %s1188_s30, %s1188_s30 }
  0x2f   :  { %p1195_p8 = por %p1194_p7, %p1193_p6 }
  0x31   :  { %p1196_p9 = pnand %p1195_p8, %p1189_p5 }
  0x33   :  { %1199 = shalt.err (!%p1196_p9)
}
  0x34   :  { %100 = dma.hbm_to_vmem [thread:$0]  %s1603_s9, 1024, %s95_s25, [#allocation12], %s1321_s18, %s1321_s18, %s1322_s19  }
  0x35   :  { %s1325_s14 = smov [#allocation2]   ;;  %s1326_s16 = smov [#allocation7]  }
  0x36   :  { %s29_s15 = sshll.u32 %s1325_s14, 4  ;;  %s52_s1 = sshll.u32 %s1326_s16, 4  ;;  %s30_s15 = int_to_ptr.vmem [resolvable:$true] %s29_s15  ;;  %s53_s1 = int_to_ptr.vmem [resolvable:$true] %s52_s1 }
  0x37   :  { %s1200_s20 = scalar_lea.hbm %s1594_s0, 64 }
  0x38   :  { %p1201_p10 = scmp.ne.s32.totalorder %s1594_s0, %s1200_s20  ;;  %p1204_p11 = scmp.lt.u32.totalorder %s1200_s20, %s1594_s0 }
  0x3a   :  { %p1206_p12 = pnand %p1204_p11, %p1201_p10 }
  0x3c   :  { %1209 = shalt.err (!%p1206_p12)
}
  0x3d   :  { %s1210_s9 = scalar_lea.vmem %s30_s15, 64  ;;  %p1215_p0 = scmp.lt.s32.totalorder %s30_s15, %s30_s15 }
  0x3e   :  { %p1211_p13 = scmp.ne.s32.totalorder %s30_s15, %s1210_s9  ;;  %p1216_p1 = scmp.lt.s32.totalorder %s1210_s9, %s1210_s9 }
  0x40   :  { %p1217_p2 = por %p1216_p1, %p1215_p0 }
  0x42   :  { %p1218_p3 = pnand %p1217_p2, %p1211_p13 }
  0x44   :  { %1221 = shalt.err (!%p1218_p3)
}
  0x45   :  { %32 = dma.hbm_to_vmem [thread:$0]  %s1594_s0, 64, %s30_s15, [#allocation3]  }
  0x46   :  { %s1222_s5 = scalar_lea.hbm %s1597_s3, 1024 }
  0x47   :  { %p1223_p4 = scmp.ne.s32.totalorder %s1597_s3, %s1222_s5  ;;  %p1226_p5 = scmp.lt.u32.totalorder %s1222_s5, %s1597_s3 }
  0x49   :  { %p1228_p6 = pnand %p1226_p5, %p1223_p4 }
  0x4b   :  { %1231 = shalt.err (!%p1228_p6)
}
  0x4c   :  { %s1232_s17 = scalar_lea.vmem %s53_s1, 1024  ;;  %p1237_p8 = scmp.lt.s32.totalorder %s53_s1, %s53_s1 }
  0x4d   :  { %p1233_p7 = scmp.ne.s32.totalorder %s53_s1, %s1232_s17  ;;  %p1238_p9 = scmp.lt.s32.totalorder %s1232_s17, %s1232_s17 }
  0x4f   :  { %p1239_p10 = por %p1238_p9, %p1237_p8 }
  0x51   :  { %p1240_p11 = pnand %p1239_p10, %p1233_p7 }
  0x53   :  { %1243 = shalt.err (!%p1240_p11)
}
  0x54   :  { %58 = dma.hbm_to_vmem [thread:$0]  %s1597_s3, 1024, %s53_s1, [#allocation6], %s1321_s18, %s1321_s18, %s1322_s19  }
  0x55   :  { %s1327_s20 = smov [#allocation10]   ;;  %s1328_s22 = smov [#allocation13]  }
  0x56   :  { %s80_s21 = sshll.u32 %s1327_s20, 4  ;;  %s108_s24 = sshll.u32 %s1328_s22, 4  ;;  %s81_s21 = int_to_ptr.vmem [resolvable:$true] %s80_s21  ;;  %s109_s24 = int_to_ptr.vmem [resolvable:$true] %s108_s24 }
  0x57   :  { %s1244_s25 = scalar_lea.hbm %s1601_s7, 1024 }
  0x58   :  { %p1245_p12 = scmp.ne.s32.totalorder %s1601_s7, %s1244_s25  ;;  %p1248_p13 = scmp.lt.u32.totalorder %s1244_s25, %s1601_s7 }
  0x5a   :  { %p1250_p0 = pnand %p1248_p13, %p1245_p12 }
  0x5c   :  { %1253 = shalt.err (!%p1250_p0)
}
  0x5d   :  { %s1254_s3 = scalar_lea.vmem %s81_s21, 1024  ;;  %p1259_p2 = scmp.lt.s32.totalorder %s81_s21, %s81_s21 }
  0x5e   :  { %p1255_p1 = scmp.ne.s32.totalorder %s81_s21, %s1254_s3  ;;  %p1260_p3 = scmp.lt.s32.totalorder %s1254_s3, %s1254_s3 }
  0x60   :  { %p1261_p4 = por %p1260_p3, %p1259_p2 }
  0x62   :  { %p1262_p5 = pnand %p1261_p4, %p1255_p1 }
  0x64   :  { %1265 = shalt.err (!%p1262_p5)
}
  0x65   :  { %86 = dma.hbm_to_vmem [thread:$0]  %s1601_s7, 1024, %s81_s21, [#allocation9], %s1321_s18, %s1321_s18, %s1322_s19  }
  0x66   :  { %s1266_s26 = scalar_lea.hbm %s1605_s11, 1024 }
  0x67   :  { %p1267_p6 = scmp.ne.s32.totalorder %s1605_s11, %s1266_s26  ;;  %p1270_p7 = scmp.lt.u32.totalorder %s1266_s26, %s1605_s11 }
  0x69   :  { %p1272_p8 = pnand %p1270_p7, %p1267_p6 }
  0x6b   :  { %1275 = shalt.err (!%p1272_p8)
}
  0x6c   :  { %s1276_s22 = scalar_lea.vmem %s109_s24, 1024  ;;  %p1281_p10 = scmp.lt.s32.totalorder %s109_s24, %s109_s24 }
  0x6d   :  { %p1277_p9 = scmp.ne.s32.totalorder %s109_s24, %s1276_s22  ;;  %p1282_p11 = scmp.lt.s32.totalorder %s1276_s22, %s1276_s22 }
  0x6f   :  { %p1283_p12 = por %p1282_p11, %p1281_p10 }
  0x71   :  { %p1284_p13 = pnand %p1283_p12, %p1277_p9 }
  0x73   :  { %1287 = shalt.err (!%p1284_p13)
}
  0x74   :  { %114 = dma.hbm_to_vmem [thread:$0]  %s1605_s11, 1024, %s109_s24, [#allocation12], %s1321_s18, %s1321_s18, %s1322_s19  }
  0x75   :  { %1310 = dma.done.wait [#allocation3], 64  }
  0x76   :  { %1311 = vsyncadd [#allocation3], 4294967232 }
  0x77   :  { %1312 = dma.done.wait [#allocation6], 2048  }
  0x78   :  { %1313 = vsyncadd [#allocation6], 4294965248 }
  0x79   :  { %1314 = dma.done.wait [#allocation9], 2048  }
  0x7a   :  { %1315 = vsyncadd [#allocation9], 4294965248 }
  0x7b   :  { %1316 = dma.done.wait [#allocation12], 2048  }
  0x7c   :  { %1317 = vsyncadd [#allocation12], 4294965248  ;;  %v1329_v0 = vmov 0.0   ;;  %vm1330_vm0 = vmmov 0   ;;  %v1082_v1 = vld [vmem:[#allocation5] sm:$0xff]   ;;  %v1083_v2 = vld [vmem:[#allocation5 + $0x8] sm:$0xff]  }
  0x7d   :  { %950 = vmatprep.subr.bf16.mxu0 %v1329_v0  ;;  %966 = vmatprep.mubr.msk.bf16.mxu0 %vm1330_vm0, %v1329_v0  ;;  %v1084_v3 = vld [vmem:[#allocation5 + $0x10] sm:$0xff]   ;;  %v1090_v4 = vld [vmem:[#allocation7] sm:$0xff]   ;;  %v1085_v5 = vld [vmem:[#allocation5 + $0x18] sm:$0xff]  }
  0x7e   :  { %970 = vmatprep.subr.bf16.mxu1 %v1329_v0  ;;  %986 = vmatprep.mubr.msk.bf16.mxu1 %vm1330_vm0, %v1329_v0  ;;  %v1091_v6 = vld [vmem:[#allocation7 + $0x8] sm:$0xff]   ;;  %v1086_v7 = vld [vmem:[#allocation5 + $0x20] sm:$0xff]   ;;  %v1092_v8 = vld [vmem:[#allocation7 + $0x10] sm:$0xff]  }
  0x7f   :  { %951 = vmatpush3.bf16.msra.mxu0 %v1082_v1  ;;  %971 = vmatpush3.bf16.msra.mxu1 %v1090_v4  ;;  %v1087_v9 = vld [vmem:[#allocation5 + $0x28] sm:$0xff]   ;;  %v1093_v10 = vld [vmem:[#allocation7 + $0x18] sm:$0xff]   ;;  %v1088_v11 = vld [vmem:[#allocation5 + $0x30] sm:$0xff]  }
  0x80   :  { %952 = vmatprep.subr.bf16.mxu0 %v1329_v0  ;;  %972 = vmatprep.subr.bf16.mxu1 %v1329_v0  ;;  %v1094_v12 = vld [vmem:[#allocation7 + $0x20] sm:$0xff]   ;;  %v1089_v13 = vld [vmem:[#allocation5 + $0x38] sm:$0xff]   ;;  %v1095_v14 = vld [vmem:[#allocation7 + $0x28] sm:$0xff]  }
  0x81   :  { %v139_v15 = vld [vmem:[#allocation2] sm:$0xf]  ;;  %v1096_v16 = vld [vmem:[#allocation7 + $0x30] sm:$0xff]   ;;  %v1098_v18 = vld [vmem:[#allocation8] sm:$0xff]  }
  0x82   :  { %v1097_v17 = vld [vmem:[#allocation7 + $0x38] sm:$0xff]   ;;  %v1099_v19 = vld [vmem:[#allocation8 + $0x8] sm:$0xff]   ;;  %v1100_v20 = vld [vmem:[#allocation8 + $0x10] sm:$0xff]  }
  0x83   :  { %953 = vmatpush3.bf16.msra.mxu0 %v1083_v2  ;;  %973 = vmatpush3.bf16.msra.mxu1 %v1091_v6  ;;  %v1101_v21 = vld [vmem:[#allocation8 + $0x18] sm:$0xff]   ;;  %v1102_v22 = vld [vmem:[#allocation8 + $0x20] sm:$0xff]   ;;  %v1103_v23 = vld [vmem:[#allocation8 + $0x28] sm:$0xff]  }
  0x84   :  { %954 = vmatprep.subr.bf16.mxu0 %v1329_v0  ;;  %974 = vmatprep.subr.bf16.mxu1 %v1329_v0  ;;  %v841_v24 = vld [vmem:[%s1596_s2] ss:$0 sm:$0xff]  ;;  %v1104_v32 = vld [vmem:[#allocation8 + $0x30] sm:$0xff]   ;;  %v1106_v34 = vld [vmem:[#allocation10] sm:$0xff]  }
  0x85   :  { %v1105_v33 = vld [vmem:[#allocation8 + $0x38] sm:$0xff]   ;;  %v1107_v35 = vld [vmem:[#allocation10 + $0x8] sm:$0xff]   ;;  %v1108_v36 = vld [vmem:[#allocation10 + $0x10] sm:$0xff]  }
  0x86   :  { %v1109_v37 = vld [vmem:[#allocation10 + $0x18] sm:$0xff]   ;;  %v1110_v38 = vld [vmem:[#allocation10 + $0x20] sm:$0xff]   ;;  %v1111_v39 = vld [vmem:[#allocation10 + $0x28] sm:$0xff]  }
  0x87   :  { %955 = vmatpush3.bf16.msra.mxu0 %v1084_v3  ;;  %975 = vmatpush3.bf16.msra.mxu1 %v1092_v8  ;;  %v850_v40 = vld [vmem:[%s1598_s4] ss:$0 sm:$0xff]  ;;  %v1112_v48 = vld [vmem:[#allocation10 + $0x30] sm:$0xff]   ;;  %v1114_v50 = vld [vmem:[#allocation11] sm:$0xff]  }
  0x88   :  { %956 = vmatprep.subr.bf16.mxu0 %v1329_v0  ;;  %976 = vmatprep.subr.bf16.mxu1 %v1329_v0  ;;  %v1113_v49 = vld [vmem:[#allocation10 + $0x38] sm:$0xff]   ;;  %v1115_v51 = vld [vmem:[#allocation11 + $0x8] sm:$0xff]   ;;  %v1116_v52 = vld [vmem:[#allocation11 + $0x10] sm:$0xff]  }
  0x89   :  { %v1117_v53 = vld [vmem:[#allocation11 + $0x18] sm:$0xff]   ;;  %v1118_v54 = vld [vmem:[#allocation11 + $0x20] sm:$0xff]   ;;  %v1119_v55 = vld [vmem:[#allocation11 + $0x28] sm:$0xff]  }
  0x8a   :  { %v859_v56 = vld [vmem:[%s1600_s6] ss:$0 sm:$0xff]  ;;  %v1120_v1 = vld [vmem:[#allocation11 + $0x30] sm:$0xff]   ;;  %v1122_v3 = vld [vmem:[#allocation13] sm:$0xff]  }
  0x8b   :  { %957 = vmatpush3.bf16.msra.mxu0 %v1085_v5  ;;  %977 = vmatpush3.bf16.msra.mxu1 %v1093_v10  ;;  %v1121_v2 = vld [vmem:[#allocation11 + $0x38] sm:$0xff]   ;;  %v1123_v4 = vld [vmem:[#allocation13 + $0x8] sm:$0xff]   ;;  %v1124_v5 = vld [vmem:[#allocation13 + $0x10] sm:$0xff]  }
  0x8c   :  { %958 = vmatprep.subr.bf16.mxu0 %v1329_v0  ;;  %978 = vmatprep.subr.bf16.mxu1 %v1329_v0  ;;  %v1125_v6 = vld [vmem:[#allocation13 + $0x18] sm:$0xff]   ;;  %v1127_v8 = vld [vmem:[#allocation13 + $0x28] sm:$0xff]  }
  0x8f   :  { %959 = vmatpush3.bf16.msra.mxu0 %v1086_v7  ;;  %979 = vmatpush3.bf16.msra.mxu1 %v1094_v12  ;;  %v1126_v7 = vld [vmem:[#allocation13 + $0x20] sm:$0xff]  }
  0x90   :  { %960 = vmatprep.subr.bf16.mxu0 %v1329_v0  ;;  %980 = vmatprep.subr.bf16.mxu1 %v1329_v0 }
  0x93   :  { %961 = vmatpush3.bf16.msra.mxu0 %v1087_v9  ;;  %981 = vmatpush3.bf16.msra.mxu1 %v1095_v14  ;;  %v868_v9 = vld [vmem:[%s1602_s8] ss:$0 sm:$0xff] }
  0x94   :  { %962 = vmatprep.subr.bf16.mxu0 %v1329_v0  ;;  %982 = vmatprep.subr.bf16.mxu1 %v1329_v0 }
  0x97   :  { %963 = vmatpush3.bf16.msra.mxu0 %v1088_v11  ;;  %983 = vmatpush3.bf16.msra.mxu1 %v1096_v16 }
  0x98   :  { %964 = vmatprep.subr.bf16.mxu0 %v1329_v0  ;;  %984 = vmatprep.subr.bf16.mxu1 %v1329_v0 }
  0x9b   :  { %965 = vmatpush3.bf16.msra.mxu0 %v1089_v13  ;;  %985 = vmatpush3.bf16.msra.mxu1 %v1097_v17  ;;  %v1128_v17 = vld [vmem:[#allocation13 + $0x30] sm:$0xff]  }
  0x9c   :  { %990 = vmatprep.subr.bf16.mxu0 %v1329_v0  ;;  %1010 = vmatprep.subr.bf16.mxu1 %v1329_v0 }
  0x9e   :  { %967 = vmatmul.mubr.bf16.vlgmr.msra.gmra.mrb[0].mxu0 %v139_v15 }
  0x9f   :  { %1006 = vmatprep.mubr.msk.bf16.mxu0 %vm1330_vm0, %v1329_v0  ;;  %991 = vmatpush3.bf16.msra.mxu0 %v1098_v18  ;;  %v1129_v18 = vld [vmem:[#allocation13 + $0x38] sm:$0xff]  }
  0xa0   :  { %992 = vmatprep.subr.bf16.mxu0 %v1329_v0 }
  0xa3   :  { %993 = vmatpush3.bf16.msra.mxu0 %v1099_v19  ;;  %v877_v19 = vld [vmem:[%s1604_s10] ss:$0 sm:$0xff]  ;;  %s1331_s10 = smov [#allocation14]  }
  0xa4   :  { %994 = vmatprep.subr.bf16.mxu0 %v1329_v0  ;;  %s829_s29 = sshll.u32 %s1331_s10, 4  ;;  %s830_s29 = int_to_ptr.vmem [resolvable:$true] %s829_s29 }
  0xa5   :  { %s1288_s30 = scalar_lea.vmem %s830_s29, 128  ;;  %p1293_p1 = scmp.lt.s32.totalorder %s830_s29, %s830_s29 }
  0xa6   :  { %p1289_p0 = scmp.ne.s32.totalorder %s830_s29, %s1288_s30  ;;  %p1294_p2 = scmp.lt.s32.totalorder %s1288_s30, %s1288_s30 }
  0xa7   :  { %995 = vmatpush3.bf16.msra.mxu0 %v1100_v20 }
  0xa8   :  { %996 = vmatprep.subr.bf16.mxu0 %v1329_v0  ;;  %p1295_p3 = por %p1294_p2, %p1293_p1 }
  0xaa   :  { %p1296_p4 = pnand %p1295_p3, %p1289_p0 }
  0xab   :  { %997 = vmatpush3.bf16.msra.mxu0 %v1101_v21 }
  0xac   :  { %998 = vmatprep.subr.bf16.mxu0 %v1329_v0 }
  0xaf   :  { %999 = vmatpush3.bf16.msra.mxu0 %v1102_v22 }
  0xb0   :  { %1000 = vmatprep.subr.bf16.mxu0 %v1329_v0 }
  0xb3   :  { %1001 = vmatpush3.bf16.msra.mxu0 %v1103_v23 }
  0xb4   :  { %1002 = vmatprep.subr.bf16.mxu0 %v1329_v0 }
  0xb7   :  { %1003 = vmatpush3.bf16.msra.mxu0 %v1104_v32 }
  0xb8   :  { %1004 = vmatprep.subr.bf16.mxu0 %v1329_v0 }
  0xbb   :  { %1005 = vmatpush3.bf16.msra.mxu0 %v1105_v33 }
  0xbc   :  { %1030 = vmatprep.subr.bf16.mxu0 %v1329_v0 }
 0x171   :  { %v245_v25 = vpop.f32.mrb[0].mxu0 }
 0x172   :  { %v246_v26 = vadd.f32 %v841_v24, %v245_v25  ;;  %v968_v27 = vpop.f32.mrb[1].mxu0 }
 0x173   :  { %v248_v28 = vpop.f32.mrb[2].mxu0  ;;  %v886_v27 = vld [vmem:[%s1606_s12] ss:$0 sm:$0xff] }
 0x174   :  { %v251_v29 = vmax.f32 %v246_v26, 0.0  ;;  %v969_v30 = vpop.f32.mrb[3].mxu0 }
 0x176   :  { %v252_v31 = vpack.c.bf16 %v251_v29, %v251_v29 }
 0x178   :  { %987 = vmatmul.mubr.bf16.vlgmr.msra.gmra.mrb[0].mxu1 %v252_v31 }
 0x179   :  { %1026 = vmatprep.mubr.msk.bf16.mxu1 %vm1330_vm0, %v1329_v0  ;;  %1011 = vmatpush3.bf16.msra.mxu1 %v1106_v34 }
 0x17a   :  { %1012 = vmatprep.subr.bf16.mxu1 %v1329_v0 }
 0x17d   :  { %1013 = vmatpush3.bf16.msra.mxu1 %v1107_v35 }
 0x17e   :  { %1014 = vmatprep.subr.bf16.mxu1 %v1329_v0 }
 0x181   :  { %1015 = vmatpush3.bf16.msra.mxu1 %v1108_v36 }
 0x182   :  { %1016 = vmatprep.subr.bf16.mxu1 %v1329_v0 }
 0x185   :  { %1017 = vmatpush3.bf16.msra.mxu1 %v1109_v37 }
 0x186   :  { %1018 = vmatprep.subr.bf16.mxu1 %v1329_v0 }
 0x189   :  { %1019 = vmatpush3.bf16.msra.mxu1 %v1110_v38 }
 0x18a   :  { %1020 = vmatprep.subr.bf16.mxu1 %v1329_v0 }
 0x18d   :  { %1021 = vmatpush3.bf16.msra.mxu1 %v1111_v39 }
 0x18e   :  { %1022 = vmatprep.subr.bf16.mxu1 %v1329_v0 }
 0x191   :  { %1023 = vmatpush3.bf16.msra.mxu1 %v1112_v48 }
 0x192   :  { %1024 = vmatprep.subr.bf16.mxu1 %v1329_v0 }
 0x195   :  { %1025 = vmatpush3.bf16.msra.mxu1 %v1113_v49 }
 0x196   :  { %1050 = vmatprep.subr.bf16.mxu1 %v1329_v0 }
 0x24b   :  { %v358_v41 = vpop.f32.mrb[0].mxu1 }
 0x24c   :  { %v359_v42 = vadd.f32 %v850_v40, %v358_v41  ;;  %v988_v43 = vpop.f32.mrb[1].mxu1 }
 0x24d   :  { %v361_v44 = vpop.f32.mrb[2].mxu1 }
 0x24e   :  { %v364_v45 = vmax.f32 %v359_v42, 0.0  ;;  %v989_v46 = vpop.f32.mrb[3].mxu1 }
 0x250   :  { %v365_v47 = vpack.c.bf16 %v364_v45, %v364_v45 }
 0x252   :  { %1007 = vmatmul.mubr.bf16.vlgmr.msra.gmra.mrb[4].mxu0 %v365_v47 }
 0x253   :  { %1046 = vmatprep.mubr.msk.bf16.mxu0 %vm1330_vm0, %v1329_v0  ;;  %1031 = vmatpush3.bf16.msra.mxu0 %v1114_v50 }
 0x254   :  { %1032 = vmatprep.subr.bf16.mxu0 %v1329_v0 }
 0x257   :  { %1033 = vmatpush3.bf16.msra.mxu0 %v1115_v51 }
 0x258   :  { %1034 = vmatprep.subr.bf16.mxu0 %v1329_v0 }
 0x25b   :  { %1035 = vmatpush3.bf16.msra.mxu0 %v1116_v52 }
 0x25c   :  { %1036 = vmatprep.subr.bf16.mxu0 %v1329_v0 }
 0x25f   :  { %1037 = vmatpush3.bf16.msra.mxu0 %v1117_v53 }
 0x260   :  { %1038 = vmatprep.subr.bf16.mxu0 %v1329_v0 }
 0x263   :  { %1039 = vmatpush3.bf16.msra.mxu0 %v1118_v54 }
 0x264   :  { %1040 = vmatprep.subr.bf16.mxu0 %v1329_v0 }
 0x267   :  { %1041 = vmatpush3.bf16.msra.mxu0 %v1119_v55 }
 0x268   :  { %1042 = vmatprep.subr.bf16.mxu0 %v1329_v0 }
 0x26b   :  { %1043 = vmatpush3.bf16.msra.mxu0 %v1120_v1 }
 0x26c   :  { %1044 = vmatprep.subr.bf16.mxu0 %v1329_v0 }
 0x26f   :  { %1045 = vmatpush3.bf16.msra.mxu0 %v1121_v2 }
 0x325   :  { %v471_v57 = vpop.f32.mrb[4].mxu0 }
 0x326   :  { %v472_v58 = vadd.f32 %v859_v56, %v471_v57  ;;  %v1008_v59 = vpop.f32.mrb[5].mxu0 }
 0x327   :  { %v474_v60 = vpop.f32.mrb[6].mxu0 }
 0x328   :  { %v477_v61 = vmax.f32 %v472_v58, 0.0  ;;  %v1009_v62 = vpop.f32.mrb[7].mxu0 }
 0x32a   :  { %v478_v63 = vpack.c.bf16 %v477_v61, %v477_v61 }
 0x32c   :  { %1027 = vmatmul.mubr.bf16.vlgmr.msra.gmra.mrb[4].mxu1 %v478_v63 }
 0x32d   :  { %1066 = vmatprep.mubr.msk.bf16.mxu1 %vm1330_vm0, %v1329_v0  ;;  %1051 = vmatpush3.bf16.msra.mxu1 %v1122_v3 }
 0x32e   :  { %1052 = vmatprep.subr.bf16.mxu1 %v1329_v0 }
 0x331   :  { %1053 = vmatpush3.bf16.msra.mxu1 %v1123_v4 }
 0x332   :  { %1054 = vmatprep.subr.bf16.mxu1 %v1329_v0 }
 0x335   :  { %1055 = vmatpush3.bf16.msra.mxu1 %v1124_v5 }
 0x336   :  { %1056 = vmatprep.subr.bf16.mxu1 %v1329_v0 }
 0x339   :  { %1057 = vmatpush3.bf16.msra.mxu1 %v1125_v6 }
 0x33a   :  { %1058 = vmatprep.subr.bf16.mxu1 %v1329_v0 }
 0x33d   :  { %1059 = vmatpush3.bf16.msra.mxu1 %v1126_v7 }
 0x33e   :  { %1060 = vmatprep.subr.bf16.mxu1 %v1329_v0 }
 0x341   :  { %1061 = vmatpush3.bf16.msra.mxu1 %v1127_v8 }
 0x342   :  { %1062 = vmatprep.subr.bf16.mxu1 %v1329_v0 }
 0x345   :  { %1063 = vmatpush3.bf16.msra.mxu1 %v1128_v17 }
 0x346   :  { %1064 = vmatprep.subr.bf16.mxu1 %v1329_v0 }
 0x349   :  { %1065 = vmatpush3.bf16.msra.mxu1 %v1129_v18 }
 0x3ff   :  { %v584_v10 = vpop.f32.mrb[4].mxu1 }
 0x400   :  { %v585_v11 = vadd.f32 %v868_v9, %v584_v10  ;;  %v1028_v12 = vpop.f32.mrb[5].mxu1 }
 0x401   :  { %v587_v13 = vpop.f32.mrb[6].mxu1 }
 0x402   :  { %v590_v14 = vmax.f32 %v585_v11, 0.0  ;;  %v1029_v15 = vpop.f32.mrb[7].mxu1 }
 0x404   :  { %v591_v16 = vpack.c.bf16 %v590_v14, %v590_v14 }
 0x406   :  { %1047 = vmatmul.mubr.bf16.vlgmr.msra.gmra.mrb[8].mxu0 %v591_v16 }
 0x4d9   :  { %v697_v20 = vpop.f32.mrb[8].mxu0 }
 0x4da   :  { %v698_v21 = vadd.f32 %v877_v19, %v697_v20  ;;  %v1048_v22 = vpop.f32.mrb[9].mxu0 }
 0x4db   :  { %v700_v23 = vpop.f32.mrb[10].mxu0 }
 0x4dc   :  { %v703_v24 = vmax.f32 %v698_v21, 0.0  ;;  %v1049_v25 = vpop.f32.mrb[11].mxu0 }
 0x4de   :  { %v704_v26 = vpack.c.bf16 %v703_v24, %v703_v24 }
 0x4e0   :  { %1067 = vmatmul.mubr.bf16.vlgmr.msra.gmra.mrb[8].mxu1 %v704_v26 }
 0x5b3   :  { %v810_v28 = vpop.f32.mrb[8].mxu1 }
 0x5b4   :  { %v811_v0 = vadd.f32 %v886_v27, %v810_v28  ;;  %v1068_v29 = vpop.f32.mrb[9].mxu1 }
 0x5b5   :  { %v813_v30 = vpop.f32.mrb[10].mxu1 }
 0x5b6   :  { %v895_v31 = vmul.f32 -1.442695, %v811_v0  ;;  %v1069_v32 = vpop.f32.mrb[11].mxu1 }
 0x5b8   :  { %1130 = vpow2.f32 %v895_v31 }
 0x5c2   :  { %v1131_v33 = vpop.eup %1130 }
 0x5c3   :  { %v819_v34 = vadd.f32 1.0, %v1131_v33 }
 0x5c5   :  { %1132 = vrcp.f32 %v819_v34 }
 0x5cf   :  { %v1133_v35 = vpop.eup %1132 }
 0x5d0   :  { %822 = vst [vmem:[#allocation14] sm:$0xff] %v1133_v35 }
 0x5d1   :  { %1299 = shalt.err (!%p1296_p4)
}
 0x5d2   :  { %s1300_s3 = scalar_lea.hbm %s1607_s13, 128 }
 0x5d3   :  { %p1301_p5 = scmp.ne.s32.totalorder %s1607_s13, %s1300_s3  ;;  %p1304_p6 = scmp.lt.u32.totalorder %s1300_s3, %s1607_s13 }
 0x5d5   :  { %p1306_p7 = pnand %p1304_p6, %p1301_p5 }
 0x5d7   :  { %1309 = shalt.err (!%p1306_p7)
}
 0x5d8   :  { %832 = dma.vmem_to_hbm [thread:$0]  %s830_s29, 128, %s1607_s13, [#allocation4]  }
 0x5d9   :  { %1318 = dma.done.wait [#allocation4], 128  }
 0x5da   :  { %1319 = vsyncadd [#allocation4], 4294967168 }
 0x5db   :  { %836 = vsyncpa [#allocation3], 1 }
 0x5dc   :  { %837 = vsyncpa [#allocation6], 1 }
 0x5dd   :  { %838 = vsyncpa [#allocation9], 1 }
 0x5de   :  { %839 = vsyncpa [#allocation12], 1 }
 0x5df   :  { %840 = vsyncpa [#allocation4], 1 }

</bundles_post_ra>
